<compile_context>
chip_gen: v5e
topology: v5e:2x2
jax: 0.10.0
libtpu: 0.0.40
codegen_flags: <defaults>
</compile_context>

<pallas_src>
import jax
import jax.numpy as jnp
import numpy as np
from jax.experimental import pallas as pl
from jax.experimental.pallas import tpu as pltpu


# ---------------------------------------------------------------------------
# Kernels
# ---------------------------------------------------------------------------

def _pool_sum_kernel(x_ref, sum_ref, acc_ref):
    # x_ref: (TR, THW); sum_ref: (TR, 1); acc_ref: (TR, 1) f32 scratch.
    k = pl.program_id(1)

    @pl.when(k == 0)
    def _():
        acc_ref[...] = jnp.zeros_like(acc_ref)

    # Force f32 accumulation even for bf16 inputs.
    acc_ref[...] += jnp.sum(x_ref[...].astype(jnp.float32), axis=-1,
                            keepdims=True)

    @pl.when(k == pl.num_programs(1) - 1)
    def _():
        sum_ref[...] = acc_ref[...]


def _scale_mul_kernel(x_ref, s_ref, o_ref):
    # x_ref: (TR, THW); s_ref: (TR, 1) f32; o_ref: (TR, THW).
    s = s_ref[...].astype(o_ref.dtype)            # cast once per tile
    o_ref[...] = x_ref[...] * s                   # broadcast over lanes


# ---------------------------------------------------------------------------
# Wrapper
# ---------------------------------------------------------------------------

_ROW_TILE_MAX = 256       # rows per block (folds batch * channel)
_LANE_TILE_MAX = 2048     # lanes per block  -> f32 block up to 2 MiB
_VMEM_LIMIT = 32 * 1024 * 1024   # explicit scoped-VMEM limit (safe on v5e/v6e/v7x)


def _round_up(x, m):
    return ((x + m - 1) // m) * m


def ca_layer(x_nchw, w1, w2):
    """Channel attention. x_nchw: (N, C, H, W); w1: (C//r, C); w2: (C, C//r)."""
    N, C, H, W = x_nchw.shape
    HW = H * W
    NC = N * C
    dtype = x_nchw.dtype
    itemsize = jnp.dtype(dtype).itemsize

    # Lane-dense, VMEM-friendly tiling of the flattened (N*C, HW) view.
    hw128 = _round_up(HW, 128)
    thw = min(hw128, _LANE_TILE_MAX)
    hw_p = _round_up(hw128, thw)

    r8 = _round_up(NC, 8)
    tr = min(r8, _ROW_TILE_MAX)
    r_p = _round_up(r8, tr)

    x2 = x_nchw.reshape(NC, HW)
    pad_r, pad_c = r_p - NC, hw_p - HW
    if pad_r or pad_c:
        x2 = jnp.pad(x2, ((0, pad_r), (0, pad_c)))   # zero pad: sums unaffected

    grid = (r_p // tr, hw_p // thw)

    # -------- Pass 1: global average pool (sum reduction over HW) ----------
    sums = pl.pallas_call(
        _pool_sum_kernel,
        out_shape=jax.ShapeDtypeStruct((r_p, 1), jnp.float32),
        grid_spec=pltpu.PrefetchScalarGridSpec(
            num_scalar_prefetch=0,
            grid=grid,
            in_specs=[pl.BlockSpec((tr, thw), lambda i, k: (i, k))],
            out_specs=pl.BlockSpec((tr, 1), lambda i, k: (i, 0)),
            scratch_shapes=[pltpu.VMEM((tr, 1), jnp.float32)]),
        compiler_params=pltpu.CompilerParams(
            dimension_semantics=("parallel", "arbitrary"),
            vmem_limit_bytes=_VMEM_LIMIT),
        cost_estimate=pl.CostEstimate(
            flops=r_p * hw_p,
            transcendentals=0,
            bytes_accessed=r_p * hw_p * itemsize + r_p * 4),
    )(x2)

    # -------- Tiny squeeze-excite (O(N*C)): batched over all N in JAX -------
    pooled = (sums[:NC, 0] / jnp.float32(HW)).reshape(N, C)          # (N, C)
    y1 = jnp.maximum(pooled @ w1.astype(jnp.float32).T, 0.0)         # (N, C//r)
    y2 = jax.nn.sigmoid(y1 @ w2.astype(jnp.float32).T)               # (N, C)
    scale = y2.reshape(NC, 1)
    if pad_r:
        scale = jnp.pad(scale, ((0, pad_r), (0, 0)))

    # -------- Pass 2: broadcast multiply (HBM-bandwidth bound) --------------
    out2 = pl.pallas_call(
        _scale_mul_kernel,
        out_shape=jax.ShapeDtypeStruct((r_p, hw_p), dtype),
        grid_spec=pltpu.PrefetchScalarGridSpec(
            num_scalar_prefetch=0,
            grid=grid,
            in_specs=[
                pl.BlockSpec((tr, thw), lambda i, k: (i, k)),
                pl.BlockSpec((tr, 1), lambda i, k: (i, 0)),
            ],
            out_specs=pl.BlockSpec((tr, thw), lambda i, k: (i, k))),
        compiler_params=pltpu.CompilerParams(
            dimension_semantics=("parallel", "parallel"),
            vmem_limit_bytes=_VMEM_LIMIT),
        cost_estimate=pl.CostEstimate(
            flops=r_p * hw_p,
            transcendentals=0,
            bytes_accessed=2 * r_p * hw_p * itemsize + r_p * 4),
    )(x2, scale)

    return out2[:NC, :HW].reshape(N, C, H, W)


# ---------------------------------------------------------------------------
# Pure-JAX reference (matches the PyTorch forward)
# ---------------------------------------------------------------------------

def ca_layer_ref(x, w1, w2):
    pooled = jnp.mean(x.astype(jnp.float32), axis=(2, 3))            # (N, C)
    y1 = jnp.maximum(pooled @ w1.astype(jnp.float32).T, 0.0)         # (N, C//r)
    y2 = jax.nn.sigmoid(y1 @ w2.astype(jnp.float32).T)               # (N, C)
    return x * y2[:, :, None, None].astype(x.dtype)


if __name__ == "__main__":
    # Small shapes consistent with the module: channel=32, reduction=16.
    N, C, H, W = 2, 32, 16, 16
    reduction = 16
    C_red = C // reduction

    key = jax.random.PRNGKey(0)
    kx, k1, k2 = jax.random.split(key, 3)

    x = jax.random.normal(kx, (N, C, H, W), dtype=jnp.float32)
    # Deterministic 1x1 conv weights (bias=False), squeezed from (out, in, 1, 1).
    w1 = jax.random.normal(k1, (C_red, C), dtype=jnp.float32) * (1.0 / np.sqrt(C))
    w2 = jax.random.normal(k2, (C, C_red), dtype=jnp.float32) * (1.0 / np.sqrt(C_red))

    out = jax.block_until_ready(ca_layer(x, w1, w2))
    ref = jax.block_until_ready(ca_layer_ref(x, w1, w2))

    np.testing.assert_allclose(np.asarray(out), np.asarray(ref),
                               rtol=1e-5, atol=1e-5)
    print("KERNEL_OK")
</pallas_src>

<mosaic_0001>
module attributes {stable_mosaic.version = 11 : i64} {
  func.func @_pool_sum_kernel(%arg0: i32, %arg1: i32, %arg2: memref<64x256xf32, #tpu.memory_space<vmem>>, %arg3: memref<64x1xf32, #tpu.memory_space<vmem>>, %arg4: memref<64x1xf32, #tpu.memory_space<vmem>>) attributes {dimension_semantics = [#tpu.dimension_semantics<parallel>, #tpu.dimension_semantics<arbitrary>], iteration_bounds = array<i64: 1, 1>, scalar_prefetch = 0 : i64, scratch_operands = 1 : i64, tpu.core_type = #tpu.core_type<tc>, window_params = [{transform_indices = @transform_0, window_bounds = array<i64: 64, 256>}, {transform_indices = @transform_1, window_bounds = array<i64: 64, 1>}]} {
    %c0_i32 = arith.constant 0 : i32
    %0 = arith.cmpi eq, %arg1, %c0_i32 : i32
    %1 = arith.extui %0 : i1 to i32
    %c0_i32_0 = arith.constant 0 : i32
    %2 = arith.cmpi ne, %1, %c0_i32_0 : i32
    scf.if %2 {
      %cst_8 = arith.constant 0.000000e+00 : f32
      %12 = vector.broadcast %cst_8 : f32 to vector<64x1xf32>
      %c0_9 = arith.constant 0 : index
      %c0_10 = arith.constant 0 : index
      %13 = vector.load %arg4[%c0_9, %c0_10] : memref<64x1xf32, #tpu.memory_space<vmem>>, vector<64x1xf32>
      tpu.vector_store %arg4[%c0_9, %c0_10], %12 {strides = array<i32>} : memref<64x1xf32, #tpu.memory_space<vmem>>, vector<64x1xf32>,
    } else {
    }
    %c0 = arith.constant 0 : index
    %c0_1 = arith.constant 0 : index
    %3 = vector.load %arg4[%c0, %c0_1] : memref<64x1xf32, #tpu.memory_space<vmem>>, vector<64x1xf32>
    %c0_2 = arith.constant 0 : index
    %c0_3 = arith.constant 0 : index
    %4 = vector.load %arg2[%c0_2, %c0_3] : memref<64x256xf32, #tpu.memory_space<vmem>>, vector<64x256xf32>
    %cst = arith.constant dense<0.000000e+00> : vector<64xf32>
    %5 = vector.multi_reduction <add>, %4, %cst [1] : vector<64x256xf32> to vector<64xf32>
    %6 = vector.shape_cast %5 : vector<64xf32> to vector<64x1xf32>
    %7 = arith.addf %3, %6 : vector<64x1xf32>
    %c0_4 = arith.constant 0 : index
    %c0_5 = arith.constant 0 : index
    %8 = vector.load %arg4[%c0_4, %c0_5] : memref<64x1xf32, #tpu.memory_space<vmem>>, vector<64x1xf32>
    tpu.vector_store %arg4[%c0_4, %c0_5], %7 {strides = array<i32>} : memref<64x1xf32, #tpu.memory_space<vmem>>, vector<64x1xf32>,
    %c0_i32_6 = arith.constant 0 : i32
    %9 = arith.cmpi eq, %arg1, %c0_i32_6 : i32
    %10 = arith.extui %9 : i1 to i32
    %c0_i32_7 = arith.constant 0 : i32
    %11 = arith.cmpi ne, %10, %c0_i32_7 : i32
    scf.if %11 {
      %c0_8 = arith.constant 0 : index
      %c0_9 = arith.constant 0 : index
      %12 = vector.load %arg4[%c0_8, %c0_9] : memref<64x1xf32, #tpu.memory_space<vmem>>, vector<64x1xf32>
      %c0_10 = arith.constant 0 : index
      %c0_11 = arith.constant 0 : index
      %13 = vector.load %arg3[%c0_10, %c0_11] : memref<64x1xf32, #tpu.memory_space<vmem>>, vector<64x1xf32>
      tpu.vector_store %arg3[%c0_10, %c0_11], %12 {strides = array<i32>} : memref<64x1xf32, #tpu.memory_space<vmem>>, vector<64x1xf32>,
    } else {
    }
    return
  }
  func.func @transform_0(%arg0: i32, %arg1: i32) -> (i32, i32) {
    %c0_i32 = arith.constant 0 : i32
    return %arg0, %arg1 : i32, i32
  }
  func.func @transform_1(%arg0: i32, %arg1: i32) -> (i32, i32) {
    %c0_i32 = arith.constant 0 : i32
    %c0_i32_0 = arith.constant 0 : i32
    return %arg0, %c0_i32 : i32, i32
  }
}

</mosaic_0001>

<bundles_post_ra>
// kernel: tpu_custom_call.1
= control target key start
LH: loop header
LB: loop body
LE: loop exit
PB: predicated region body
PF: predicated region fallthrough
CT: control target
= control target key end

     0   :  { %6 = vsyncpa [#allocation4], 0  ;;  %s156_s9 = smov [#allocation3]   ;;  %s157_s11 = smov 256   ;;  %s221_s0 = inlined_call_operand.hbm [shape: f32[64,256], index: 0, kind: input, shape index: {}]   ;;  %s222_s1 = inlined_call_operand.vmem [shape: f32[64,1], index: 1, kind: output, shape index: {}]  }
   0x1   :  { %s11_s8 = sshll.u32 %s221_s0, 4  ;;  %s13_s10 = sshll.u32 %s156_s9, 4  ;;  %s12_s8 = int_to_ptr.hbm [resolvable:$true] %s11_s8  ;;  %s14_s10 = int_to_ptr.vmem [resolvable:$true] %s13_s10 }
   0x2   :  { %s158_s12 = smov 16  }
   0x3   :  { %19 = dma.hbm_to_vmem [thread:$0]  %s12_s8, 2048, %s14_s10, [#allocation4], %s157_s11, %s157_s11, %s158_s12  }
   0x4   :  { %154 = dma.done.wait [#allocation4], 2048  }
   0x5   :  { %155 = vsyncadd [#allocation4], 4294965248  ;;  %vm28_vm0 = vcmask 7168   ;;  %v159_v0 = vmov 0.0   ;;  %v49_v1 = vld [vmem:[#allocation3 + $0x20] sm:$0xff]  ;;  %v50_v2 = vld [vmem:[#allocation3 + $0x28] sm:$0xff] }
   0x6   :  { %31 = vst.msk [vmem:[#allocation2 + $0x10] sm:$0xff] %vm28_vm0, %v159_v0  ;;  %v45_v3 = vld [vmem:[#allocation3] sm:$0xff]  ;;  %v67_v4 = vadd.f32 %v50_v2, %v49_v1  ;;  %v46_v5 = vld [vmem:[#allocation3 + $0x8] sm:$0xff]  ;;  %v51_v10 = vld [vmem:[#allocation3 + $0x30] sm:$0xff] }
   0x7   :  { %29 = vst.msk [vmem:[#allocation2] sm:$0xff] %vm28_vm0, %v159_v0  ;;  %v53_v6 = vld [vmem:[#allocation3 + $0x40] sm:$0xff]  ;;  %v54_v7 = vld [vmem:[#allocation3 + $0x48] sm:$0xff]  ;;  %v61_v8 = vadd.f32 %v46_v5, %v45_v3  ;;  %v52_v11 = vld [vmem:[#allocation3 + $0x38] sm:$0xff] }
   0x8   :  { %30 = vst.msk [vmem:[#allocation2 + $0x8] sm:$0xff] %vm28_vm0, %v159_v0  ;;  %v73_v9 = vadd.f32 %v54_v7, %v53_v6  ;;  %68 = vadd.xlane.f32.xlu1 %v67_v4  ;;  %v47_v12 = vld [vmem:[#allocation3 + $0x10] sm:$0xff]  ;;  %v48_v13 = vld [vmem:[#allocation3 + $0x18] sm:$0xff]  ;;  %v70_v16 = vadd.f32 %v52_v11, %v51_v10  ;;  %v57_v21 = vld [vmem:[#allocation3 + $0x60] sm:$0xff] }
   0x9   :  { %32 = vst.msk [vmem:[#allocation2 + $0x18] sm:$0xff] %vm28_vm0, %v159_v0  ;;  %62 = vadd.xlane.f32.xlu0 %v61_v8  ;;  %v55_v14 = vld [vmem:[#allocation3 + $0x50] sm:$0xff]  ;;  %v56_v15 = vld [vmem:[#allocation3 + $0x58] sm:$0xff]  ;;  %v64_v17 = vadd.f32 %v48_v13, %v47_v12  ;;  %v58_v22 = vld [vmem:[#allocation3 + $0x68] sm:$0xff] }
   0xa   :  { %33 = vst.msk [vmem:[#allocation2 + $0x20] sm:$0xff] %vm28_vm0, %v159_v0  ;;  %74 = vadd.xlane.f32.xlu2 %v73_v9  ;;  %v76_v18 = vadd.f32 %v56_v15, %v55_v14  ;;  %v59_v19 = vld [vmem:[#allocation3 + $0x70] sm:$0xff]  ;;  %v60_v20 = vld [vmem:[#allocation3 + $0x78] sm:$0xff]  ;;  %v79_v24 = vadd.f32 %v58_v22, %v57_v21 }
   0xb   :  { %34 = vst.msk [vmem:[#allocation2 + $0x28] sm:$0xff] %vm28_vm0, %v159_v0  ;;  %v82_v23 = vadd.f32 %v60_v20, %v59_v19 }
   0xc   :  { %35 = vst.msk [vmem:[#allocation2 + $0x30] sm:$0xff] %vm28_vm0, %v159_v0 }
   0xd   :  { %36 = vst.msk [vmem:[#allocation2 + $0x38] sm:$0xff] %vm28_vm0, %v159_v0  ;;  %v39_v25 = vld [vmem:[#allocation2 + $0x10] sm:$0xff] }
   0xe   :  { %v37_v26 = vld [vmem:[#allocation2] sm:$0xff] }
   0xf   :  { %v38_v36 = vld [vmem:[#allocation2 + $0x8] sm:$0xff] }
  0x10   :  { %71 = vadd.xlane.f32.xlu1 %v70_v16  ;;  %v40_v34 = vld [vmem:[#allocation2 + $0x18] sm:$0xff] }
  0x11   :  { %65 = vadd.xlane.f32.xlu0 %v64_v17  ;;  %v41_v27 = vld [vmem:[#allocation2 + $0x20] sm:$0xff] }
  0x12   :  { %77 = vadd.xlane.f32.xlu2 %v76_v18  ;;  %v42_v39 = vld [vmem:[#allocation2 + $0x28] sm:$0xff] }
  0x13   :  { %v43_v47 = vld [vmem:[#allocation2 + $0x30] sm:$0xff] }
  0x14   :  { %v44_v46 = vld [vmem:[#allocation2 + $0x38] sm:$0xff] }
  0x18   :  { %83 = vadd.xlane.f32.xlu1 %v82_v23 }
  0x19   :  { %80 = vadd.xlane.f32.xlu0 %v79_v24 }
  0x7b   :  { %v69_v28 = vpop.xlane.xlu1 %68 }
  0x7c   :  { %v87_v29 = vadd.f32 %v69_v28, %v39_v25  ;;  %v63_v30 = vpop.xlane.xlu0 %62 }
  0x7d   :  { %v75_v31 = vpop.xlane.xlu2 %74  ;;  %v85_v32 = vadd.f32 %v63_v30, %v37_v26 }
  0x7e   :  { %v89_v33 = vadd.f32 %v75_v31, %v41_v27  ;;  %96 = vst.msk [vmem:[#allocation2 + $0x10] sm:$0xff] %vm28_vm0, %v87_v29 }
  0x7f   :  { %94 = vst.msk [vmem:[#allocation2] sm:$0xff] %vm28_vm0, %v85_v32 }
  0x80   :  { %98 = vst.msk [vmem:[#allocation2 + $0x20] sm:$0xff] %vm28_vm0, %v89_v33 }
  0x83   :  { %v72_v35 = vpop.xlane.xlu1 %71 }
  0x84   :  { %v66_v37 = vpop.xlane.xlu0 %65  ;;  %v88_v41 = vadd.f32 %v72_v35, %v40_v34 }
  0x85   :  { %v78_v38 = vpop.xlane.xlu2 %77  ;;  %v107_v40 = vld [vmem:[#allocation2 + $0x10] sm:$0xff]  ;;  %v86_v43 = vadd.f32 %v66_v37, %v38_v36 }
  0x86   :  { %115 = vst.msk [vmem:[%s222_s1 + $0x10] sm:$0xff] %vm28_vm0, %v107_v40  ;;  %v105_v42 = vld [vmem:[#allocation2] sm:$0xff]  ;;  %v90_v45 = vadd.f32 %v78_v38, %v42_v39 }
  0x87   :  { %113 = vst.msk [vmem:[%s222_s1] sm:$0xff] %vm28_vm0, %v105_v42  ;;  %v109_v44 = vld [vmem:[#allocation2 + $0x20] sm:$0xff] }
  0x88   :  { %117 = vst.msk [vmem:[%s222_s1 + $0x20] sm:$0xff] %vm28_vm0, %v109_v44 }
  0x89   :  { %97 = vst.msk [vmem:[#allocation2 + $0x18] sm:$0xff] %vm28_vm0, %v88_v41 }
  0x8a   :  { %95 = vst.msk [vmem:[#allocation2 + $0x8] sm:$0xff] %vm28_vm0, %v86_v43 }
  0x8b   :  { %99 = vst.msk [vmem:[#allocation2 + $0x28] sm:$0xff] %vm28_vm0, %v90_v45  ;;  %v84_v48 = vpop.xlane.xlu1 %83 }
  0x8c   :  { %v92_v49 = vadd.f32 %v84_v48, %v44_v46  ;;  %v81_v50 = vpop.xlane.xlu0 %80 }
  0x8d   :  { %v91_v51 = vadd.f32 %v81_v50, %v43_v47 }
  0x8e   :  { %101 = vst.msk [vmem:[#allocation2 + $0x38] sm:$0xff] %vm28_vm0, %v92_v49 }
  0x8f   :  { %100 = vst.msk [vmem:[#allocation2 + $0x30] sm:$0xff] %vm28_vm0, %v91_v51 }
  0x90   :  { %v108_v52 = vld [vmem:[#allocation2 + $0x18] sm:$0xff] }
  0x91   :  { %116 = vst.msk [vmem:[%s222_s1 + $0x18] sm:$0xff] %vm28_vm0, %v108_v52  ;;  %v106_v53 = vld [vmem:[#allocation2 + $0x8] sm:$0xff] }
  0x92   :  { %114 = vst.msk [vmem:[%s222_s1 + $0x8] sm:$0xff] %vm28_vm0, %v106_v53  ;;  %v110_v54 = vld [vmem:[#allocation2 + $0x28] sm:$0xff] }
  0x93   :  { %118 = vst.msk [vmem:[%s222_s1 + $0x28] sm:$0xff] %vm28_vm0, %v110_v54 }
  0x95   :  { %v112_v55 = vld [vmem:[#allocation2 + $0x38] sm:$0xff] }
  0x96   :  { %120 = vst.msk [vmem:[%s222_s1 + $0x38] sm:$0xff] %vm28_vm0, %v112_v55  ;;  %v111_v56 = vld [vmem:[#allocation2 + $0x30] sm:$0xff] }
  0x97   :  { %119 = vst.msk [vmem:[%s222_s1 + $0x30] sm:$0xff] %vm28_vm0, %v111_v56 }
  0x98   :  { %125 = vsyncpa [#allocation4], 1 }

</bundles_post_ra>
